<compile_context>
chip_gen: v7x
topology: tpu7x:2x2x1
jax: 0.10.0
libtpu: 0.0.40
codegen_flags: <defaults>
</compile_context>

<pallas_src>
import math

import jax
import jax.numpy as jnp
from jax.experimental import pallas as pl
from jax.experimental.pallas import tpu as pltpu


def _round_up(n, m):
    return ((n + m - 1) // m) * m


def _vmem_capacity_bytes():
    """Physical VMEM per TensorCore, with a conservative (v7x-sized) fallback."""
    try:
        cap = int(pltpu.get_tpu_info().vmem_capacity_bytes)
        if cap > 0:
            return cap
    except Exception:
        pass
    return 64 << 20  # v7x per-TC physical VMEM; safe lower bound for all generations


def _logreg_kernel(x_ref, w_ref, b_ref, o_ref):
    # Linear: y = x @ W + b  (f32 accumulation on the MXU; bias is f32, added post-MXU).
    y = jnp.dot(x_ref[...], w_ref[...], preferred_element_type=jnp.float32)
    y = y + b_ref[...]

    # F.normalize(y, p=2, dim=1, eps=1e-12) == y / max(||y||_2, 1e-12)
    #                                       == y * rsqrt(max(sum(y^2), 1e-24))
    # Padded W/bias columns are zero, so summing over the full padded width is exact.
    sumsq = jnp.sum(y * y, axis=-1, keepdims=True)
    inv = jax.lax.rsqrt(jnp.maximum(sumsq, 1e-24))

    # Store only the true class columns (output array is unpadded in HBM).
    n_out = o_ref.shape[-1]
    o_ref[...] = (y[:, :n_out] * inv).astype(o_ref.dtype)


def prepare_params(w, b, *, dtype=None):
    """One-time parameter prep (hoisted out of the forward).

    Pads the class dim of W / bias up to a lane-dense multiple of 128 for the MXU.
    Padded columns are zero and do not perturb the L2 norm.  Returns
    (w_padded [ft_in, n_pad], bias_padded [1, n_pad] f32, nb_classes).
    """
    ft_in, nb_classes = w.shape
    n_pad = _round_up(max(nb_classes, 128), 128)
    if n_pad != nb_classes:
        w = jnp.pad(w, ((0, 0), (0, n_pad - nb_classes)))
        b = jnp.pad(b, (0, n_pad - nb_classes))
    if dtype is not None:
        w = w.astype(dtype)  # optional bf16 weights (accumulation stays f32 in-kernel)
    b2 = b.reshape(1, n_pad).astype(jnp.float32)
    return w, b2, nb_classes


def logreg_forward(x, w_p, b_p, nb_classes, *, tile_m=None):
    """x: (B, ft_in), w_p: (ft_in, n_pad) [from prepare_params], b_p: (1, n_pad) f32."""
    B, ft_in = x.shape
    n_pad = w_p.shape[1]
    assert b_p.shape == (1, n_pad)
    assert nb_classes <= n_pad

    # Per-generation VMEM budget for the pipelined blocks.
    phys = _vmem_capacity_bytes()
    vmem_budget = max(16 << 20, min(phys // 2 - (4 << 20), 48 << 20))

    # tile_m: aim for >= 2 grid steps (v7x megacore), cap at 1024, clamp to budget.
    if tile_m is None:
        tile_m = min(1024, _round_up(pl.cdiv(B, 2), 8))
    tile_m = max(8, _round_up(tile_m, 8))
    # Budget in f32 words: 2x double-buffered x tiles + 2x resident W + 2x bias
    # + 2x double-buffered (unpadded) output tiles.
    max_tm = (vmem_budget // 4 - 2 * ft_in * n_pad - 2 * n_pad) // (
        2 * (ft_in + nb_classes)
    )
    max_tm = max(8, (max_tm // 8) * 8)
    tile_m = min(tile_m, max_tm)  # also validates caller-supplied tile_m

    grid = (pl.cdiv(B, tile_m),)  # partial last tile: OOB rows masked on write

    footprint = 4 * (
        2 * tile_m * ft_in + 2 * ft_in * n_pad + 2 * n_pad + 2 * tile_m * nb_classes
    )
    vmem_limit = int(
        min(
            max(footprint * 3 // 2 + (2 << 20), 16 << 20),
            max(phys - (8 << 20), 16 << 20),
        )
    )

    out = pl.pallas_call(
        _logreg_kernel,
        out_shape=jax.ShapeDtypeStruct((B, nb_classes), x.dtype),
        grid_spec=pltpu.PrefetchScalarGridSpec(
            num_scalar_prefetch=0,
            grid=grid,
            in_specs=[
                pl.BlockSpec((tile_m, ft_in), lambda i: (i, 0)),
                pl.BlockSpec((ft_in, n_pad), lambda i: (0, 0)),   # grid-invariant
                pl.BlockSpec((1, n_pad), lambda i: (0, 0)),       # grid-invariant
            ],
            out_specs=pl.BlockSpec((tile_m, nb_classes), lambda i: (i, 0)),
        ),
        compiler_params=pltpu.CompilerParams(
            dimension_semantics=("parallel",),  # shard batch tiles across TCs on v7x
            vmem_limit_bytes=vmem_limit,
        ),
    )(x, w_p, b_p)

    return out


def init_params(key, ft_in, nb_classes):
    # torch.nn.init.xavier_uniform_ on weight of shape (nb_classes, ft_in):
    #   bound = sqrt(6 / (fan_in + fan_out)) = sqrt(6 / (ft_in + nb_classes))
    bound = math.sqrt(6.0 / (ft_in + nb_classes))
    w_torch_layout = jax.random.uniform(
        key, (nb_classes, ft_in), minval=-bound, maxval=bound, dtype=jnp.float32
    )
    w = w_torch_layout.T  # store as (ft_in, nb_classes) so the kernel does x @ W
    b = jnp.zeros((nb_classes,), dtype=jnp.float32)  # bias.fill_(0.0)
    return w, b


if __name__ == "__main__":
    key = jax.random.PRNGKey(0)
    k_x, k_w = jax.random.split(key)

    batch, ft_in, nb_classes = 8, 32, 16

    x = jax.random.normal(k_x, (batch, ft_in), dtype=jnp.float32)
    w, b = init_params(k_w, ft_in, nb_classes)

    # One-time param prep (padding hoisted out of the forward).
    w_p, b_p, n_out = prepare_params(w, b)

    out = logreg_forward(x, w_p, b_p, n_out)
    out = jax.block_until_ready(out)

    # Reference check in plain JAX (same math as the PyTorch forward).
    y_ref = x @ w + b[None, :]
    n_ref = jnp.maximum(jnp.linalg.norm(y_ref, axis=1, keepdims=True), 1e-12)
    ref = y_ref / n_ref
    assert out.shape == (batch, nb_classes)
    assert jnp.allclose(out, ref, atol=1e-5, rtol=1e-5)

    print("KERNEL_OK")
</pallas_src>

<mosaic_0001>
module attributes {stable_mosaic.version = 11 : i64} {
  func.func @_logreg_kernel(%arg0: i32, %arg1: memref<8x32xf32, #tpu.memory_space<vmem>>, %arg2: memref<32x128xf32, #tpu.memory_space<vmem>>, %arg3: memref<1x128xf32, #tpu.memory_space<vmem>>, %arg4: memref<8x16xf32, #tpu.memory_space<vmem>>) attributes {dimension_semantics = [#tpu.dimension_semantics<parallel>], iteration_bounds = array<i64: 1>, scalar_prefetch = 0 : i64, scratch_operands = 0 : i64, tpu.core_type = #tpu.core_type<tc>, window_params = [{transform_indices = @transform_0, window_bounds = array<i64: 8, 32>}, {pipeline_mode = #tpu.pipeline_mode<synchronous>, transform_indices = @transform_1, window_bounds = array<i64: 32, 128>}, {pipeline_mode = #tpu.pipeline_mode<synchronous>, transform_indices = @transform_2, window_bounds = array<i64: 1, 128>}, {transform_indices = @transform_3, window_bounds = array<i64: 8, 16>}]} {
    %c0 = arith.constant 0 : index
    %c0_0 = arith.constant 0 : index
    %0 = vector.load %arg1[%c0, %c0_0] : memref<8x32xf32, #tpu.memory_space<vmem>>, vector<8x32xf32>
    %c0_1 = arith.constant 0 : index
    %c0_2 = arith.constant 0 : index
    %1 = vector.load %arg2[%c0_1, %c0_2] : memref<32x128xf32, #tpu.memory_space<vmem>>, vector<32x128xf32>
    %cst = arith.constant dense<0.000000e+00> : vector<8x128xf32>
    %2 = tpu.matmul %0, %1, %cst {dimension_numbers = #tpu.dot_dimension_numbers<[1], [0], [0], [1], [0, 0, 1, 1], [], []>} : vector<8x32xf32>, vector<32x128xf32>, vector<8x128xf32> -> vector<8x128xf32>
    %c0_3 = arith.constant 0 : index
    %c0_4 = arith.constant 0 : index
    %3 = vector.load %arg3[%c0_3, %c0_4] : memref<1x128xf32, #tpu.memory_space<vmem>>, vector<1x128xf32>
    %4 = vector.broadcast %3 : vector<1x128xf32> to vector<8x128xf32>
    %5 = arith.addf %2, %4 : vector<8x128xf32>
    %6 = arith.mulf %5, %5 : vector<8x128xf32>
    %cst_5 = arith.constant dense<0.000000e+00> : vector<8xf32>
    %7 = vector.multi_reduction <add>, %6, %cst_5 [1] : vector<8x128xf32> to vector<8xf32>
    %8 = vector.shape_cast %7 : vector<8xf32> to vector<8x1xf32>
    %cst_6 = arith.constant 1.000000e-24 : f32
    %9 = vector.broadcast %cst_6 : f32 to vector<8x1xf32>
    %10 = arith.maximumf %8, %9 : vector<8x1xf32>
    %11 = math.rsqrt %10 : vector<8x1xf32>
    %12 = vector.extract_strided_slice %5 {offsets = [0, 0], sizes = [8, 16], strides = [1, 1]} : vector<8x128xf32> to vector<8x16xf32>
    %13 = vector.broadcast %11 : vector<8x1xf32> to vector<8x16xf32>
    %14 = arith.mulf %12, %13 : vector<8x16xf32>
    %c0_7 = arith.constant 0 : index
    %c0_8 = arith.constant 0 : index
    %15 = vector.load %arg4[%c0_7, %c0_8] : memref<8x16xf32, #tpu.memory_space<vmem>>, vector<8x16xf32>
    tpu.vector_store %arg4[%c0_7, %c0_8], %14 {strides = array<i32>} : memref<8x16xf32, #tpu.memory_space<vmem>>, vector<8x16xf32>,
    return
  }
  func.func @transform_0(%arg0: i32) -> (i32, i32) {
    %c0_i32 = arith.constant 0 : i32
    %c0_i32_0 = arith.constant 0 : i32
    return %arg0, %c0_i32 : i32, i32
  }
  func.func @transform_1(%arg0: i32) -> (i32, i32) {
    %c0_i32 = arith.constant 0 : i32
    %c0_i32_0 = arith.constant 0 : i32
    %c0_i32_1 = arith.constant 0 : i32
    return %c0_i32, %c0_i32_0 : i32, i32
  }
  func.func @transform_2(%arg0: i32) -> (i32, i32) {
    %c0_i32 = arith.constant 0 : i32
    %c0_i32_0 = arith.constant 0 : i32
    %c0_i32_1 = arith.constant 0 : i32
    return %c0_i32, %c0_i32_0 : i32, i32
  }
  func.func @transform_3(%arg0: i32) -> (i32, i32) {
    %c0_i32 = arith.constant 0 : i32
    %c0_i32_0 = arith.constant 0 : i32
    return %arg0, %c0_i32 : i32, i32
  }
}

</mosaic_0001>

<bundles_post_ra>
// kernel: tpu_custom_call.1
= control target key start
LH: loop header
LB: loop body
LE: loop exit
PB: predicated region body
PF: predicated region fallthrough
CT: control target
= control target key end

     0   :  { %8 = vsyncpa [#allocation3], 0  ;;  %s331_s0 = inlined_call_operand.hbm [shape: f32[8,32], index: 0, kind: input, shape index: {}]   ;;  %s332_s1 = inlined_call_operand.hbm [shape: f32[32,128], index: 1, kind: input, shape index: {}]   ;;  %s333_s2 = inlined_call_operand.vmem [shape: f32[1,128], index: 2, kind: input, shape index: {}]   ;;  %s334_s3 = inlined_call_operand.hbm [shape: f32[8,16], index: 3, kind: output, shape index: {}]  }
   0x1   :  { %9 = vsyncpa [#allocation6], 0 }
   0x2   :  { %10 = vsyncpa [#allocation4], 0  ;;  %s257_s12 = smov [#allocation2]   ;;  %s258_s14 = smov [#allocation5]  }
   0x3   :  { %s17_s13 = sshll.u32 %s257_s12, 4  ;;  %s26_s15 = sshll.u32 %s258_s14, 4  ;;  %s18_s13 = int_to_ptr.vmem [resolvable:$true] %s17_s13  ;;  %s285_s15 = int_to_ptr.vmem [resolvable:$true] %s26_s15 }
   0x4   :  { %s185_s18 = scalar_lea.hbm %s331_s0, 128 }
   0x5   :  { %p186_p0 = scmp.ne.s32.totalorder %s331_s0, %s185_s18  ;;  %p189_p1 = scmp.lt.u32.totalorder %s185_s18, %s331_s0 }
   0x7   :  { %p191_p2 = pnand %p189_p1, %p186_p0 }
   0x9   :  { %194 = shalt.err (!%p191_p2)
}
   0xa   :  { %s195_s23 = scalar_lea.vmem %s18_s13, 128  ;;  %p200_p4 = scmp.lt.s32.totalorder %s18_s13, %s18_s13 }
   0xb   :  { %p196_p3 = scmp.ne.s32.totalorder %s18_s13, %s195_s23  ;;  %p201_p5 = scmp.lt.s32.totalorder %s195_s23, %s195_s23 }
   0xd   :  { %p202_p6 = por %p201_p5, %p200_p4 }
   0xf   :  { %p203_p7 = pnand %p202_p6, %p196_p3 }
  0x11   :  { %206 = shalt.err (!%p203_p7)
}
  0x12   :  { %20 = dma.hbm_to_vmem [thread:$0]  %s331_s0, 128, %s18_s13, [#allocation3]  }
  0x13   :  { %s207_s28 = scalar_lea.hbm %s332_s1, 512 }
  0x14   :  { %p208_p8 = scmp.ne.s32.totalorder %s332_s1, %s207_s28  ;;  %p211_p9 = scmp.lt.u32.totalorder %s207_s28, %s332_s1 }
  0x16   :  { %p213_p10 = pnand %p211_p9, %p208_p8 }
  0x18   :  { %216 = shalt.err (!%p213_p10)
}
  0x19   :  { %s217_s6 = scalar_lea.vmem %s285_s15, 512  ;;  %p222_p12 = scmp.lt.s32.totalorder %s285_s15, %s285_s15 }
  0x1a   :  { %p218_p11 = scmp.ne.s32.totalorder %s285_s15, %s217_s6  ;;  %p223_p13 = scmp.lt.s32.totalorder %s217_s6, %s217_s6 }
  0x1c   :  { %p224_p0 = por %p223_p13, %p222_p12 }
  0x1e   :  { %p225_p1 = pnand %p224_p0, %p218_p11 }
  0x20   :  { %228 = shalt.err (!%p225_p1)
}
  0x21   :  { %s259_s0 = smov 128   ;;  %s260_s7 = smov 8  }
  0x22   :  { %32 = dma.hbm_to_vmem [thread:$0]  %s332_s1, 512, %s285_s15, [#allocation6], %s259_s0, %s259_s0, %s260_s7  }
  0x23   :  { %251 = dma.done.wait [#allocation3], 128  }
  0x24   :  { %252 = vsyncadd [#allocation3], 4294967168 }
  0x25   :  { %253 = dma.done.wait [#allocation6], 512  }
  0x26   :  { %254 = vsyncadd [#allocation6], 4294966784  ;;  %v261_v0 = vmov 0.0|0.0   ;;  %vm262_vm0 = vmmov 0   ;;  %v263_v1 = vmov 0.0   ;;  %v42_v2 = vld [vmem:[#allocation5] sm:$0xff] }
  0x27   :  { %169 = vmatprep.subr.bf16.mxu0 %v261_v0  ;;  %166 = vmatprep.mubr.msk.f32.mxu0 %vm262_vm0, %v263_v1  ;;  %v43_v3 = vld [vmem:[#allocation5 + $0x8] sm:$0xff]  ;;  %v44_v4 = vld [vmem:[#allocation5 + $0x10] sm:$0xff]  ;;  %v45_v6 = vld [vmem:[#allocation5 + $0x18] sm:$0xff]  ;;  %vm53_vm1 = vcmask 261120   ;;  %s264_s11 = smov [#allocation7]   ;;  %vm133_vm2 = vcmask 130048  }
  0x28   :  { %v170_v5 = vpack.c.bf16 %v43_v3, %v42_v2  ;;  %v173_v7 = vpack.c.bf16 %v45_v6, %v44_v4  ;;  %v41_v8 = vld [vmem:[#allocation2] sm:$0xff]  ;;  %s141_s12 = sshll.u32 %s264_s11, 4  ;;  %s142_s12 = int_to_ptr.vmem [resolvable:$true] %s141_s12 }
  0x29   :  { %v151_v9 = vld [vmem:[%s333_s2] ss:$0 sm:$0xff]  ;;  %s229_s13 = scalar_lea.vmem %s142_s12, 128  ;;  %p234_p3 = scmp.lt.s32.totalorder %s142_s12, %s142_s12 }
  0x2a   :  { %171 = vmatpush3.bf16.msra.mxu0 %v170_v5  ;;  %p230_p2 = scmp.ne.s32.totalorder %s142_s12, %s229_s13  ;;  %p235_p4 = scmp.lt.s32.totalorder %s229_s13, %s229_s13 }
  0x2b   :  { %172 = vmatprep.subr.bf16.mxu0 %v261_v0 }
  0x2c   :  { %p236_p5 = por %p235_p4, %p234_p3 }
  0x2e   :  { %174 = vmatpush3.bf16.msra.mxu0 %v173_v7  ;;  %p237_p6 = pnand %p236_p5, %p230_p2 }
  0x31   :  { %167 = vmatmul.mubr.msk.f32.vlgmr.msra.gmra.mrb[0].mxu0 %vm53_vm1, %v41_v8 }
 0x104   :  { %v123_v10 = vpop.f32.mrb[0].mxu0 }
 0x105   :  { %v124_v11 = vadd.f32 %v151_v9, %v123_v10  ;;  %v168_v12 = vpop.f32.mrb[1].mxu0 }
 0x107   :  { %v127_v13 = vmul.f32 %v124_v11, %v124_v11 }
 0x109   :  { %128 = vadd.xlane.f32.xlu0 %v127_v13 }
 0x196   :  { %v129_v14 = vpop.xlane.xlu0 %128 }
 0x197   :  { %v130_v15 = vmax.f32 %v129_v14, 1e-24 }
 0x199   :  { %183 = vrsqrt.f32 %v130_v15 }
 0x1a3   :  { %v184_v16 = vpop.eup %183 }
 0x1a4   :  { %v132_v17 = vmul.f32 %v184_v16, %v124_v11 }
 0x1a6   :  { %134 = vst.msk [vmem:[#allocation7] sm:$0xff] %vm133_vm2, %v132_v17 }
 0x1a7   :  { %240 = shalt.err (!%p237_p6)
}
 0x1a8   :  { %s241_s15 = scalar_lea.hbm %s334_s3, 128 }
 0x1a9   :  { %p242_p7 = scmp.ne.s32.totalorder %s334_s3, %s241_s15  ;;  %p245_p8 = scmp.lt.u32.totalorder %s241_s15, %s334_s3 }
 0x1ab   :  { %p247_p9 = pnand %p245_p8, %p242_p7 }
 0x1ad   :  { %250 = shalt.err (!%p247_p9)
}
 0x1ae   :  { %144 = dma.vmem_to_hbm [thread:$0]  %s142_s12, 128, %s334_s3, [#allocation4]  }
 0x1af   :  { %255 = dma.done.wait [#allocation4], 128  }
 0x1b0   :  { %256 = vsyncadd [#allocation4], 4294967168 }
 0x1b1   :  { %148 = vsyncpa [#allocation3], 1 }
 0x1b2   :  { %149 = vsyncpa [#allocation6], 1 }
 0x1b3   :  { %150 = vsyncpa [#allocation4], 1 }

</bundles_post_ra>
